<compile_context>
chip_gen: v7x
topology: tpu7x:2x2x1
jax: 0.10.0
libtpu: 0.0.40
codegen_flags: <defaults>
</compile_context>

<pallas_src>
import functools

import jax
import jax.numpy as jnp
import numpy as np
from jax.experimental import pallas as pl
from jax.experimental.pallas import tpu as pltpu

AVG_PER_SEQ = True  # logprob_params['avg_per_seq']

_MiB = 1024 * 1024
# Per-block byte budget for the hot cov stream. ~6 MiB double-buffered (12 MiB)
# plus the tiny side/output tiles stays inside the scoped-VMEM defaults of every
# generation (v5e/v6e 128 MiB physical, v7x 64 MiB / 32 MiB scoped) while being
# large enough to amortize the ~0.35 us per-grid-step overhead.
_DEFAULT_BLOCK_BYTES = 6 * _MiB


def _logprob_kernel(cov_ref, side_ref, out_ref, *, total_t, t_blk, mask_tail):
    """One (batch-block, T-block) tile of the masked per-sample log-prob reduce.

    cov_ref  : (b_blk, t_blk) native dtype  batch.cov_times tile (hot stream)
    side_ref : (b_blk, 2)     f32   [row_bias_eff, theta_eff] per row
                              (row_bias_eff = ((1-cens)*log(theta) - theta*event) * w,
                               theta_eff    = theta * w,  w = 1/traj_len if avg else 1)
    out_ref  : (b_blk, 1)     f32   per-sample summed logprob (accumulated over T blocks)
    """
    i = pl.program_id(0)          # batch-block index
    j = pl.program_id(1)          # T-block index (reduction axis)

    # Upcast inside the kernel (cheap, hidden under DMA; required on v5e which
    # has no bf16 VPU).
    cov = cov_ref[...].astype(jnp.float32)                       # (b_blk, t_blk)

    if mask_tail:
        # Ragged T tail: out-of-range lanes hold unspecified data -> zero them.
        col = jax.lax.broadcasted_iota(jnp.int32, cov.shape, 1) + j * t_blk
        cov = jnp.where(col < total_t, cov, 0.0)

    # Exponential-subclass algebra (deltas cancel exactly):
    #   lp[t] = theta*cov[t] + row_bias, masked where (cov[t] == 0 and row != 0)
    # Since cov == 0 at masked positions,
    #   sum_t lp = theta * sum_t(cov) + nnz * row_bias
    # with nnz = #(cov != 0), except global row 0 where every position counts.
    nz = jnp.where(cov != 0.0, 1.0, 0.0)                         # (b_blk, t_blk)
    cov_sum = jnp.sum(cov, axis=1, keepdims=True)                # (b_blk, 1)
    nnz = jnp.sum(nz, axis=1, keepdims=True)                     # (b_blk, 1)

    # padding_indicators[0, :] = False  -> global batch row 0 is never padding.
    if mask_tail:
        n_valid = jnp.minimum(t_blk, total_t - j * t_blk).astype(jnp.float32)
    else:
        n_valid = jnp.float32(t_blk)
    row_iota = jax.lax.broadcasted_iota(jnp.int32, nnz.shape, 0)  # (b_blk, 1)
    is_global_row0 = jnp.logical_and(i == 0, row_iota == 0)
    nnz = jnp.where(is_global_row0, n_valid, nnz)

    bias_eff = side_ref[:, 0:1]                                  # (b_blk, 1)
    theta_eff = side_ref[:, 1:2]                                 # (b_blk, 1)
    partial = theta_eff * cov_sum + bias_eff * nnz               # (b_blk, 1)

    @pl.when(j == 0)
    def _():
        out_ref[...] = partial

    @pl.when(j > 0)
    def _():
        out_ref[...] = out_ref[...] + partial


def _as_f32(x):
    x = jnp.asarray(x)
    return x if x.dtype == jnp.float32 else x.astype(jnp.float32)


def _round_up(x, m):
    return (x + m - 1) // m * m


def delta_ij_base_logprob(deltas, event_times, cov_times,
                          censoring_indicators, traj_lens, global_theta,
                          avg_per_seq=AVG_PER_SEQ,
                          block_bytes=_DEFAULT_BLOCK_BYTES):
    """Forward pass: returns ret.mean(), as in the PyTorch module."""
    del deltas  # cancels analytically for the Exponential hooks; never read.

    # Hot stream: keep native floating dtype (no wrapper-side HBM pass).
    cov = jnp.asarray(cov_times)
    if not jnp.issubdtype(cov.dtype, jnp.floating):
        cov = cov.astype(jnp.float32)
    B, T = cov.shape
    bytes_per_elem = jnp.dtype(cov.dtype).itemsize

    # Tiny (B,) side computations, fused by XLA; folded so the kernel does only
    # two per-row muls + one add after the reduction.
    ev = _as_f32(event_times).reshape(-1)
    cens = _as_f32(censoring_indicators).reshape(-1)
    tl = _as_f32(traj_lens).reshape(-1)
    theta = _as_f32(global_theta).reshape(())
    log_theta = jnp.log(theta)

    uncens = jnp.where(cens != 0.0, 0.0, 1.0)          # matches torch .bool() (nonzero)
    row_bias = uncens * log_theta - theta * ev         # (B,)
    w = (1.0 / tl) if avg_per_seq else jnp.ones_like(tl)
    side = jnp.stack([row_bias * w, jnp.broadcast_to(theta, (B,)) * w], axis=1)  # (B, 2) f32

    # ---- tiling --------------------------------------------------------------
    # Batch block: byte budget, multiple of 8, and at most ceil(B/2) rows so the
    # grid has >= 2 parallel blocks whenever B > 8 (keeps both v7x TCs busy).
    rows_budget = max(8, (block_bytes // (bytes_per_elem * max(T, 1))) // 8 * 8)
    b_blk = int(min(_round_up(B, 8), rows_budget, _round_up(pl.cdiv(B, 2), 8)))
    num_b = int(pl.cdiv(B, b_blk))

    # T block: single block unless even the 8-row block blows the budget, then
    # tile T (multiple of 128) as an "arbitrary" reduction axis with an
    # accumulator output. Ragged tails are masked in-kernel.
    if b_blk * T * bytes_per_elem <= block_bytes or T <= 128:
        t_blk, num_t = T, 1
    else:
        t_blk = max(128, (block_bytes // (b_blk * bytes_per_elem)) // 128 * 128)
        t_blk = int(min(t_blk, _round_up(T, 128)))
        num_t = int(pl.cdiv(T, t_blk))
    mask_tail = (num_t * t_blk != T)

    cov_block_bytes = b_blk * t_blk * bytes_per_elem
    vmem_limit = int(min(32 * _MiB, max(16 * _MiB, 4 * cov_block_bytes + 4 * _MiB)))

    kernel = functools.partial(_logprob_kernel, total_t=T, t_blk=t_blk,
                               mask_tail=mask_tail)

    per_sample = pl.pallas_call(
        kernel,
        out_shape=jax.ShapeDtypeStruct((B, 1), jnp.float32),
        grid=(num_b, num_t),
        in_specs=[
            pl.BlockSpec((b_blk, t_blk), lambda i, j: (i, j)),   # cov_times (hot stream)
            pl.BlockSpec((b_blk, 2), lambda i, j: (i, 0)),       # packed per-row side data
        ],
        out_specs=pl.BlockSpec((b_blk, 1), lambda i, j: (i, 0)), # resident across T blocks
        compiler_params=pltpu.CompilerParams(
            dimension_semantics=("parallel", "arbitrary"),
            vmem_limit_bytes=vmem_limit),
    )(cov, side)

    ret = per_sample[:, 0]
    # TODO(synk): host-side extreme-loss-count dict update (batch.shuffled_idxs) not translated.
    return jnp.mean(ret)


def _reference(deltas, event_times, cov_times, censoring_indicators,
               traj_lens, global_theta, avg_per_seq=AVG_PER_SEQ):
    """Pure-JAX reference mirroring the PyTorch forward (full, un-simplified formula)."""
    theta = jnp.float32(global_theta)
    d = deltas[..., 0]
    shifted_event = event_times[:, None] + d
    shifted_cov = cov_times + d
    logpdf = jnp.log(theta) - theta * shifted_event
    logsurv = -theta * shifted_event
    lognorm = -theta * shifted_cov
    lp = jnp.where(censoring_indicators[:, None] != 0, logsurv, logpdf) - lognorm
    pad = (cov_times == 0)
    pad = pad.at[0, :].set(False)
    lp = (~pad).astype(jnp.float32) * lp
    if avg_per_seq:
        lp = lp / traj_lens[:, None]
    ret = jnp.sum(lp, axis=1)
    return jnp.mean(ret)


if __name__ == "__main__":
    key = jax.random.PRNGKey(0)

    def make_case(k, B, T):
        k1, k2, k3, k4 = jax.random.split(k, 4)
        deltas = jax.random.uniform(k1, (B, T, 1), jnp.float32, 0.1, 1.0)
        event_times = jax.random.uniform(k2, (B,), jnp.float32, 1.0, 5.0)
        traj_lens = jax.random.randint(k3, (B,), 2, T).astype(jnp.float32)
        t_idx = jnp.arange(T, dtype=jnp.float32)[None, :]
        cov_times = jnp.where(t_idx < traj_lens[:, None], (t_idx + 1.0) * 0.05, 0.0)
        cens = jax.random.bernoulli(k4, 0.3, (B,)).astype(jnp.float32)
        return deltas, event_times, cov_times, cens, traj_lens

    global_theta = 0.7
    cases = [
        (8, 128, None),     # canonical small case: single block
        (13, 200, None),    # ragged last batch block (no-padding path)
        (16, 300, 4096),    # tiny budget -> T-tiled reduction with masked ragged tail
    ]
    keys = jax.random.split(key, len(cases))
    for kk, (B, T, bb) in zip(keys, cases):
        args = make_case(kk, B, T)
        kwargs = {} if bb is None else {"block_bytes": bb}
        out = delta_ij_base_logprob(*args, global_theta, **kwargs)
        out = jax.block_until_ready(out)
        ref = _reference(*args, global_theta)
        np.testing.assert_allclose(np.asarray(out), np.asarray(ref),
                                   rtol=1e-4, atol=1e-5)
    print("KERNEL_OK")
</pallas_src>

<mosaic_0001>
module attributes {stable_mosaic.version = 11 : i64} {
  func.func @_logprob_kernel(%arg0: i32, %arg1: i32, %arg2: memref<8x128xf32, #tpu.memory_space<vmem>>, %arg3: memref<8x2xf32, #tpu.memory_space<vmem>>, %arg4: memref<8x1xf32, #tpu.memory_space<vmem>>) attributes {dimension_semantics = [#tpu.dimension_semantics<parallel>, #tpu.dimension_semantics<arbitrary>], iteration_bounds = array<i64: 1, 1>, scalar_prefetch = 0 : i64, scratch_operands = 0 : i64, tpu.core_type = #tpu.core_type<tc>, window_params = [{transform_indices = @transform_0, window_bounds = array<i64: 8, 128>}, {transform_indices = @transform_1, window_bounds = array<i64: 8, 2>}, {transform_indices = @transform_2, window_bounds = array<i64: 8, 1>}]} {
    %c0 = arith.constant 0 : index
    %c0_0 = arith.constant 0 : index
    %0 = vector.load %arg2[%c0, %c0_0] : memref<8x128xf32, #tpu.memory_space<vmem>>, vector<8x128xf32>
    %cst = arith.constant 0.000000e+00 : f32
    %1 = vector.broadcast %cst : f32 to vector<8x128xf32>
    %2 = arith.cmpf one, %0, %1 : vector<8x128xf32>
    %cst_1 = arith.constant 1.000000e+00 : f32
    %cst_2 = arith.constant 0.000000e+00 : f32
    %3 = vector.broadcast %cst_1 : f32 to vector<8x128xf32>
    %4 = vector.broadcast %cst_2 : f32 to vector<8x128xf32>
    %5 = arith.select %2, %3, %4 : vector<8x128xi1>, vector<8x128xf32>
    %cst_3 = arith.constant dense<0.000000e+00> : vector<8xf32>
    %6 = vector.multi_reduction <add>, %0, %cst_3 [1] : vector<8x128xf32> to vector<8xf32>
    %7 = vector.shape_cast %6 : vector<8xf32> to vector<8x1xf32>
    %cst_4 = arith.constant dense<0.000000e+00> : vector<8xf32>
    %8 = vector.multi_reduction <add>, %5, %cst_4 [1] : vector<8x128xf32> to vector<8xf32>
    %9 = vector.shape_cast %8 : vector<8xf32> to vector<8x1xf32>
    %10 = tpu.iota {dimensions = array<i32: 0>} : vector<8x1xi32>
    %c0_i32 = arith.constant 0 : i32
    %11 = arith.cmpi eq, %arg0, %c0_i32 : i32
    %c0_i32_5 = arith.constant 0 : i32
    %12 = vector.broadcast %c0_i32_5 : i32 to vector<8x1xi32>
    %13 = arith.cmpi eq, %10, %12 : vector<8x1xi32>
    %14 = vector.broadcast %11 : i1 to vector<8x1xi1>
    %15 = arith.andi %14, %13 : vector<8x1xi1>
    %cst_6 = arith.constant 1.280000e+02 : f32
    %16 = vector.broadcast %cst_6 : f32 to vector<8x1xf32>
    %17 = arith.select %15, %16, %9 : vector<8x1xi1>, vector<8x1xf32>
    %c0_7 = arith.constant 0 : index
    %c0_8 = arith.constant 0 : index
    %18 = vector.load %arg3[%c0_7, %c0_8] : memref<8x2xf32, #tpu.memory_space<vmem>>, vector<8x1xf32>
    %c0_9 = arith.constant 0 : index
    %c1 = arith.constant 1 : index
    %19 = vector.load %arg3[%c0_9, %c1] : memref<8x2xf32, #tpu.memory_space<vmem>>, vector<8x1xf32>
    %20 = arith.mulf %19, %7 : vector<8x1xf32>
    %21 = arith.mulf %18, %17 : vector<8x1xf32>
    %22 = arith.addf %20, %21 : vector<8x1xf32>
    %c0_i32_10 = arith.constant 0 : i32
    %23 = arith.cmpi eq, %arg1, %c0_i32_10 : i32
    %24 = arith.extui %23 : i1 to i32
    %c0_i32_11 = arith.constant 0 : i32
    %25 = arith.cmpi ne, %24, %c0_i32_11 : i32
    scf.if %25 {
      %c0_14 = arith.constant 0 : index
      %c0_15 = arith.constant 0 : index
      %29 = vector.load %arg4[%c0_14, %c0_15] : memref<8x1xf32, #tpu.memory_space<vmem>>, vector<8x1xf32>
      tpu.vector_store %arg4[%c0_14, %c0_15], %22 {strides = array<i32>} : memref<8x1xf32, #tpu.memory_space<vmem>>, vector<8x1xf32>,
    } else {
    }
    %c0_i32_12 = arith.constant 0 : i32
    %26 = arith.cmpi sgt, %arg1, %c0_i32_12 : i32
    %27 = arith.extui %26 : i1 to i32
    %c0_i32_13 = arith.constant 0 : i32
    %28 = arith.cmpi ne, %27, %c0_i32_13 : i32
    scf.if %28 {
      %c0_14 = arith.constant 0 : index
      %c0_15 = arith.constant 0 : index
      %29 = vector.load %arg4[%c0_14, %c0_15] : memref<8x1xf32, #tpu.memory_space<vmem>>, vector<8x1xf32>
      %30 = arith.addf %29, %22 : vector<8x1xf32>
      %c0_16 = arith.constant 0 : index
      %c0_17 = arith.constant 0 : index
      %31 = vector.load %arg4[%c0_16, %c0_17] : memref<8x1xf32, #tpu.memory_space<vmem>>, vector<8x1xf32>
      tpu.vector_store %arg4[%c0_16, %c0_17], %30 {strides = array<i32>} : memref<8x1xf32, #tpu.memory_space<vmem>>, vector<8x1xf32>,
    } else {
    }
    return
  }
  func.func @transform_0(%arg0: i32, %arg1: i32) -> (i32, i32) {
    %c0_i32 = arith.constant 0 : i32
    return %arg0, %arg1 : i32, i32
  }
  func.func @transform_1(%arg0: i32, %arg1: i32) -> (i32, i32) {
    %c0_i32 = arith.constant 0 : i32
    %c0_i32_0 = arith.constant 0 : i32
    return %arg0, %c0_i32 : i32, i32
  }
  func.func @transform_2(%arg0: i32, %arg1: i32) -> (i32, i32) {
    %c0_i32 = arith.constant 0 : i32
    %c0_i32_0 = arith.constant 0 : i32
    return %arg0, %c0_i32 : i32, i32
  }
}

</mosaic_0001>

<bundles_post_ra>
// kernel: tpu_custom_call.1
= control target key start
LH: loop header
LB: loop body
LE: loop exit
PB: predicated region body
PF: predicated region fallthrough
CT: control target
= control target key end

     0   :  { %v64_v1 = vmov 0.0   ;;  %v18_v3 = vlaneseq  ;;  %s65_s13 = smov 1   ;;  %vm43_vm2 = vcmask 7168   ;;  %s91_s0 = inlined_call_operand.vmem [shape: f32[8,128], index: 0, kind: input, shape index: {}]   ;;  %s92_s1 = inlined_call_operand.vmem [shape: f32[8,2], index: 1, kind: input, shape index: {}]   ;;  %s93_s2 = inlined_call_operand.vmem [shape: f32[8,1], index: 2, kind: output, shape index: {}]  }
   0x1   :  { %v11_v0 = vld [vmem:[%s91_s0] sm:$0xff]  ;;  %s66_s0 = smov 127  }
   0x2   :  { %vm12_vm0 = vcmp.ne.f32.partialorder %v11_v0, 0.0  ;;  %v19_v4 = vshrl.u32 %v18_v3, 7  ;;  %v27_v5 = vld [vmem:[%s92_s1] sm:$0xff] }
   0x3   :  { %v13_v2 = vsel %vm12_vm0, 1.0, %v64_v1 }
   0x4   :  { %16 = vadd.xlane.f32.xlu0 %v13_v2  ;;  %vm21_vm1 = vcmp.eq.s32.totalorder %v19_v4, 0 }
   0x8   :  { %14 = vadd.xlane.f32.xlu0 %v11_v0 }
  0x91   :  { %v17_v6 = vpop.xlane.xlu0 %16 }
  0x92   :  { %v26_v7 = vsel %vm21_vm1, 128.0, %v17_v6 }
  0x93   :  { %v29_v8 = vmul.f32 %v27_v5, %v26_v7 }
  0x95   :  { %31 = vrot.lane.b32.xlu1 %v29_v8, %s65_s13  ;;  %v15_v9 = vpop.xlane.xlu0 %14 }
  0x96   :  { %v28_v10 = vmul.f32 %v27_v5, %v15_v9 }
 0x107   :  { %v32_v11 = vpop.permute.xlu1 %31 }
 0x108   :  { %v34_v12 = vadd.f32 %v32_v11, %v28_v10 }
 0x10a   :  { %40 = vrot.lane.b32.xlu1 %v34_v12, %s66_s0 }
 0x17c   :  { %v41_v13 = vpop.permute.xlu1 %40 }
 0x17d   :  { %44 = vst.msk [vmem:[%s93_s2] sm:$0xff] %vm43_vm2, %v41_v13 }

</bundles_post_ra>
